<compile_context>
chip_gen: v5e
topology: v5e:2x2
jax: 0.10.0
libtpu: 0.0.40
codegen_flags: <defaults>
</compile_context>

<pallas_src>
import jax
import jax.numpy as jnp
from jax.experimental import pallas as pl
from jax.experimental.pallas import tpu as pltpu


def _mlpconv_kernel(xt_ref, w1_ref, w23_ref, b_ref, o_ref):
    # xt_ref: (Kpad, tm)   w1_ref: (Cout, Kpad)   w23_ref: (2, Cout, Cout)
    # b_ref: (Cout, 3) f32   o_ref: (Cout, tm)  (tm in the lane dim, lane-dense)
    cdt = w1_ref.dtype
    b1 = b_ref[:, 0:1]
    b2 = b_ref[:, 1:2]
    b3 = b_ref[:, 2:3]
    h = jnp.dot(w1_ref[...], xt_ref[...], preferred_element_type=jnp.float32)
    h = jnp.maximum(h + b1, 0.0).astype(cdt)
    h = jnp.dot(w23_ref[0], h, preferred_element_type=jnp.float32)
    h = jnp.maximum(h + b2, 0.0).astype(cdt)
    h = jnp.dot(w23_ref[1], h, preferred_element_type=jnp.float32)
    h = jnp.maximum(h + b3, 0.0)
    o_ref[...] = h.astype(o_ref.dtype)


def _num_parallel_cores():
    """TensorCores reachable through a 'parallel' grid axis on one device."""
    try:
        d = jax.devices()[0]
        if d.platform != "tpu":
            return 1
        kind = d.device_kind.lower()
        if any(t in kind for t in ("v4", "v5p", "v7")):  # 2 TCs per device
            return 2
    except Exception:  # pragma: no cover - defensive fallback
        pass
    return 1  # v5e / v6e: 1 TC per device


def _choose_tm(M, Kpad, Cout, in_elem, n_parallel):
    """Column-tile width: sized from M, balanced across n_parallel cores,
    capped by a conservative VMEM budget."""
    m_blocks = pl.cdiv(M, 128)
    n_steps = max(1, n_parallel)
    while True:
        blocks = pl.cdiv(m_blocks, n_steps)
        tm = blocks * 128
        # double-buffered input/output tiles + resident weights (upper bound)
        footprint = (2 * in_elem * Kpad * tm + 2 * 4 * Cout * tm
                     + 4 * (Cout * Kpad + 2 * Cout * Cout) + 4 * Cout * 128)
        if footprint <= (24 << 20) or blocks == 1:
            return tm
        n_steps += max(1, n_parallel)


def mlpconv_forward(x, params, kernel_size, stride, *,
                    compute_dtype=jnp.float32, n_parallel=None):
    """Forward of MLPConv. x: [B, C, D, H, W] float32 (NCDHW, like PyTorch)."""
    w1, b1, w2, b2, w3, b3 = params
    B, C, D, H, W = x.shape
    k = kernel_size
    Cout = w1.shape[0]
    Do = (D - k) // stride + 1
    Ho = (H - k) // stride + 1
    Wo = (W - k) // stride + 1

    M = B * Do * Ho * Wo
    Kdim = C * k * k * k

    # ---- glue: im2col, transposed (feature-major) layout ----
    # Feature order (c, kd, kh, kw) matches PyTorch Conv3d weight flatten order.
    patches = []
    for kd in range(k):
        for kh in range(k):
            for kw in range(k):
                patches.append(
                    x[:, :,
                      kd:kd + stride * Do:stride,
                      kh:kh + stride * Ho:stride,
                      kw:kw + stride * Wo:stride])
    p = jnp.stack(patches, axis=0)                       # [k^3, B, C, Do, Ho, Wo]
    p = jnp.transpose(p, (2, 0, 1, 3, 4, 5))             # [C, k^3, B, Do, Ho, Wo]
    xt = p.reshape(Kdim, M).astype(compute_dtype)        # X^T : [Kdim, M]

    in_elem = jnp.dtype(compute_dtype).itemsize
    out_elem = jnp.dtype(x.dtype).itemsize
    Kpad = max(pl.cdiv(Kdim, 128) * 128, 128)
    if n_parallel is None:
        n_parallel = _num_parallel_cores()
    tm = _choose_tm(M, Kpad, Cout, in_elem, n_parallel)
    Mpad = pl.cdiv(M, tm) * tm

    # Zero padding is exact; padded M columns are sliced off after the call.
    xt_p = jnp.pad(xt, ((0, Kpad - Kdim), (0, Mpad - M)))
    w1m = jnp.pad(w1.reshape(Cout, Kdim).astype(compute_dtype),
                  ((0, 0), (0, Kpad - Kdim)))            # [Cout, Kpad]
    w23 = jnp.stack([w2.reshape(Cout, Cout),
                     w3.reshape(Cout, Cout)], axis=0).astype(compute_dtype)
    bias = jnp.stack([b1, b2, b3], axis=1).astype(jnp.float32)   # [Cout, 3]

    grid = (Mpad // tm,)

    # Per-step VMEM footprint (double-buffered X / out tiles + resident weights),
    # with headroom but capped at 40 MiB so it is valid on v7x's 64 MiB VMEM.
    vmem_need = (2 * in_elem * Kpad * tm + 2 * out_elem * Cout * tm
                 + in_elem * (Cout * Kpad + 2 * Cout * Cout) + 4 * Cout * 128)
    vmem_limit = int(min(max(2 * vmem_need + (2 << 20), 16 << 20), 40 << 20))

    cost = pl.CostEstimate(
        flops=int(2 * Mpad * Cout * (Kpad + 2 * Cout)),
        transcendentals=0,
        bytes_accessed=int(in_elem * (Kpad * Mpad + Cout * Kpad + 2 * Cout * Cout)
                           + out_elem * Cout * Mpad + 4 * Cout * 3),
    )

    out = pl.pallas_call(
        _mlpconv_kernel,
        out_shape=jax.ShapeDtypeStruct((Cout, Mpad), x.dtype),
        grid_spec=pltpu.PrefetchScalarGridSpec(
            num_scalar_prefetch=0,
            grid=grid,
            in_specs=[
                pl.BlockSpec((Kpad, tm), lambda i: (0, i)),       # X^T column tile
                pl.BlockSpec((Cout, Kpad), lambda i: (0, 0)),     # W1 (resident)
                pl.BlockSpec((2, Cout, Cout), lambda i: (0, 0, 0)),  # W2 & W3
                pl.BlockSpec((Cout, 3), lambda i: (0, 0)),        # b1,b2,b3
            ],
            out_specs=pl.BlockSpec((Cout, tm), lambda i: (0, i)),
        ),
        compiler_params=pltpu.CompilerParams(
            dimension_semantics=("parallel",),
            vmem_limit_bytes=vmem_limit,
            allow_input_fusion=[True, False, False, False],
        ),
        cost_estimate=cost,
    )(xt_p, w1m, w23, bias)

    out = out[:, :M]                                   # drop M padding
    out = out.reshape(Cout, B, Do, Ho, Wo)
    out = jnp.transpose(out, (1, 0, 2, 3, 4))          # back to NCDHW
    return out


def _reference_forward(x, params, stride):
    """Plain-JAX reference (lax.conv) for correctness checking."""
    w1, b1, w2, b2, w3, b3 = params

    def conv(h, w, b, s):
        dn = jax.lax.conv_dimension_numbers(h.shape, w.shape,
                                            ('NCDHW', 'OIDHW', 'NCDHW'))
        y = jax.lax.conv_general_dilated(h, w, (s, s, s), 'VALID',
                                         dimension_numbers=dn)
        return jax.nn.relu(y + b.reshape(1, -1, 1, 1, 1))

    h = conv(x, w1, b1, stride)
    h = conv(h, w2, b2, 1)
    h = conv(h, w3, b3, 1)
    return h


def init_params(key, in_channels, out_channels, kernel_size):
    """Deterministic parameter init (shapes match nn.Conv3d)."""
    k = kernel_size
    ks = jax.random.split(key, 6)
    fan1 = in_channels * k * k * k
    fan2 = out_channels
    w1 = jax.random.normal(ks[0], (out_channels, in_channels, k, k, k), jnp.float32) / jnp.sqrt(fan1)
    b1 = jax.random.normal(ks[1], (out_channels,), jnp.float32) * 0.01
    w2 = jax.random.normal(ks[2], (out_channels, out_channels, 1, 1, 1), jnp.float32) / jnp.sqrt(fan2)
    b2 = jax.random.normal(ks[3], (out_channels,), jnp.float32) * 0.01
    w3 = jax.random.normal(ks[4], (out_channels, out_channels, 1, 1, 1), jnp.float32) / jnp.sqrt(fan2)
    b3 = jax.random.normal(ks[5], (out_channels,), jnp.float32) * 0.01
    return (w1, b1, w2, b2, w3, b3)


if __name__ == "__main__":
    B, Cin, D, H, W = 2, 4, 16, 16, 16
    Cout, ksize, stride = 32, 3, 2

    key = jax.random.PRNGKey(0)
    kx, kp = jax.random.split(key)
    x = jax.random.normal(kx, (B, Cin, D, H, W), jnp.float32)
    params = init_params(kp, Cin, Cout, ksize)

    ref = jax.block_until_ready(_reference_forward(x, params, stride))

    # f32 path: tight correctness gate.
    fwd_f32 = jax.jit(lambda xx, pp: mlpconv_forward(xx, pp, ksize, stride))
    out = jax.block_until_ready(fwd_f32(x, params))
    assert out.shape == ref.shape, (out.shape, ref.shape)
    assert jnp.allclose(out, ref, atol=1e-4, rtol=1e-4), \
        float(jnp.max(jnp.abs(out - ref)))

    # bf16 operand path (halves the dominant HBM read); looser sanity check.
    fwd_bf16 = jax.jit(lambda xx, pp: mlpconv_forward(
        xx, pp, ksize, stride, compute_dtype=jnp.bfloat16))
    out_bf16 = jax.block_until_ready(fwd_bf16(x, params))
    rel_err = float(jnp.max(jnp.abs(out_bf16 - ref)) / jnp.max(jnp.abs(ref)))
    assert rel_err < 5e-2, rel_err

    print("KERNEL_OK")
</pallas_src>

<mosaic_0001>
module attributes {stable_mosaic.version = 11 : i64} {
  func.func @_mlpconv_kernel(%arg0: i32, %arg1: memref<128x768xf32, #tpu.memory_space<vmem>>, %arg2: memref<32x128xf32, #tpu.memory_space<vmem>>, %arg3: memref<2x32x32xf32, #tpu.memory_space<vmem>>, %arg4: memref<32x3xf32, #tpu.memory_space<vmem>>, %arg5: memref<32x768xf32, #tpu.memory_space<vmem>>) attributes {dimension_semantics = [#tpu.dimension_semantics<parallel>], iteration_bounds = array<i64: 1>, scalar_prefetch = 0 : i64, scratch_operands = 0 : i64, tpu.core_type = #tpu.core_type<tc>, window_params = [{transform_indices = @transform_0, window_bounds = array<i64: 128, 768>}, {pipeline_mode = #tpu.pipeline_mode<synchronous>, transform_indices = @transform_1, window_bounds = array<i64: 32, 128>}, {pipeline_mode = #tpu.pipeline_mode<synchronous>, transform_indices = @transform_2, window_bounds = array<i64: 2, 32, 32>}, {pipeline_mode = #tpu.pipeline_mode<synchronous>, transform_indices = @transform_3, window_bounds = array<i64: 32, 3>}, {transform_indices = @transform_4, window_bounds = array<i64: 32, 768>}]} {
    %c0 = arith.constant 0 : index
    %c0_0 = arith.constant 0 : index
    %0 = vector.load %arg4[%c0, %c0_0] : memref<32x3xf32, #tpu.memory_space<vmem>>, vector<32x1xf32>
    %c0_1 = arith.constant 0 : index
    %c1 = arith.constant 1 : index
    %1 = vector.load %arg4[%c0_1, %c1] : memref<32x3xf32, #tpu.memory_space<vmem>>, vector<32x1xf32>
    %c0_2 = arith.constant 0 : index
    %c2 = arith.constant 2 : index
    %2 = vector.load %arg4[%c0_2, %c2] : memref<32x3xf32, #tpu.memory_space<vmem>>, vector<32x1xf32>
    %c0_3 = arith.constant 0 : index
    %c0_4 = arith.constant 0 : index
    %3 = vector.load %arg2[%c0_3, %c0_4] : memref<32x128xf32, #tpu.memory_space<vmem>>, vector<32x128xf32>
    %c0_5 = arith.constant 0 : index
    %c0_6 = arith.constant 0 : index
    %4 = vector.load %arg1[%c0_5, %c0_6] : memref<128x768xf32, #tpu.memory_space<vmem>>, vector<128x768xf32>
    %cst = arith.constant dense<0.000000e+00> : vector<32x768xf32>
    %5 = tpu.matmul %3, %4, %cst {dimension_numbers = #tpu.dot_dimension_numbers<[1], [0], [0], [1], [0, 0, 1, 1], [], []>} : vector<32x128xf32>, vector<128x768xf32>, vector<32x768xf32> -> vector<32x768xf32>
    %6 = vector.broadcast %0 : vector<32x1xf32> to vector<32x768xf32>
    %7 = arith.addf %5, %6 : vector<32x768xf32>
    %cst_7 = arith.constant 0.000000e+00 : f32
    %8 = vector.broadcast %cst_7 : f32 to vector<32x768xf32>
    %9 = arith.maximumf %7, %8 : vector<32x768xf32>
    %c0_8 = arith.constant 0 : index
    %c0_9 = arith.constant 0 : index
    %c0_10 = arith.constant 0 : index
    %10 = vector.load %arg3[%c0_8, %c0_9, %c0_10] : memref<2x32x32xf32, #tpu.memory_space<vmem>>, vector<1x32x32xf32>
    %11 = vector.shape_cast %10 : vector<1x32x32xf32> to vector<32x32xf32>
    %cst_11 = arith.constant dense<0.000000e+00> : vector<32x768xf32>
    %12 = tpu.matmul %11, %9, %cst_11 {dimension_numbers = #tpu.dot_dimension_numbers<[1], [0], [0], [1], [0, 0, 1, 1], [], []>} : vector<32x32xf32>, vector<32x768xf32>, vector<32x768xf32> -> vector<32x768xf32>
    %13 = vector.broadcast %1 : vector<32x1xf32> to vector<32x768xf32>
    %14 = arith.addf %12, %13 : vector<32x768xf32>
    %cst_12 = arith.constant 0.000000e+00 : f32
    %15 = vector.broadcast %cst_12 : f32 to vector<32x768xf32>
    %16 = arith.maximumf %14, %15 : vector<32x768xf32>
    %c1_13 = arith.constant 1 : index
    %c0_14 = arith.constant 0 : index
    %c0_15 = arith.constant 0 : index
    %17 = vector.load %arg3[%c1_13, %c0_14, %c0_15] : memref<2x32x32xf32, #tpu.memory_space<vmem>>, vector<1x32x32xf32>
    %18 = vector.shape_cast %17 : vector<1x32x32xf32> to vector<32x32xf32>
    %cst_16 = arith.constant dense<0.000000e+00> : vector<32x768xf32>
    %19 = tpu.matmul %18, %16, %cst_16 {dimension_numbers = #tpu.dot_dimension_numbers<[1], [0], [0], [1], [0, 0, 1, 1], [], []>} : vector<32x32xf32>, vector<32x768xf32>, vector<32x768xf32> -> vector<32x768xf32>
    %20 = vector.broadcast %2 : vector<32x1xf32> to vector<32x768xf32>
    %21 = arith.addf %19, %20 : vector<32x768xf32>
    %cst_17 = arith.constant 0.000000e+00 : f32
    %22 = vector.broadcast %cst_17 : f32 to vector<32x768xf32>
    %23 = arith.maximumf %21, %22 : vector<32x768xf32>
    %c0_18 = arith.constant 0 : index
    %c0_19 = arith.constant 0 : index
    %24 = vector.load %arg5[%c0_18, %c0_19] : memref<32x768xf32, #tpu.memory_space<vmem>>, vector<32x768xf32>
    tpu.vector_store %arg5[%c0_18, %c0_19], %23 {strides = array<i32>} : memref<32x768xf32, #tpu.memory_space<vmem>>, vector<32x768xf32>,
    return
  }
  func.func @transform_0(%arg0: i32) -> (i32, i32) {
    %c0_i32 = arith.constant 0 : i32
    %c0_i32_0 = arith.constant 0 : i32
    return %c0_i32, %arg0 : i32, i32
  }
  func.func @transform_1(%arg0: i32) -> (i32, i32) {
    %c0_i32 = arith.constant 0 : i32
    %c0_i32_0 = arith.constant 0 : i32
    %c0_i32_1 = arith.constant 0 : i32
    return %c0_i32, %c0_i32_0 : i32, i32
  }
  func.func @transform_2(%arg0: i32) -> (i32, i32, i32) {
    %c0_i32 = arith.constant 0 : i32
    %c0_i32_0 = arith.constant 0 : i32
    %c0_i32_1 = arith.constant 0 : i32
    %c0_i32_2 = arith.constant 0 : i32
    return %c0_i32, %c0_i32_0, %c0_i32_1 : i32, i32, i32
  }
  func.func @transform_3(%arg0: i32) -> (i32, i32) {
    %c0_i32 = arith.constant 0 : i32
    %c0_i32_0 = arith.constant 0 : i32
    %c0_i32_1 = arith.constant 0 : i32
    return %c0_i32, %c0_i32_0 : i32, i32
  }
  func.func @transform_4(%arg0: i32) -> (i32, i32) {
    %c0_i32 = arith.constant 0 : i32
    %c0_i32_0 = arith.constant 0 : i32
    return %c0_i32, %arg0 : i32, i32
  }
}

</mosaic_0001>

<bundles_post_ra>
// kernel: _lambda_.2
= control target key start
LH: loop header
LB: loop body
LE: loop exit
PB: predicated region body
PF: predicated region fallthrough
CT: control target
= control target key end

     0   :  { %v104_v1 = vlaneseq  ;;  %vm1751_vm2 = vcmask 261120   ;;  %s3075_s0 = inlined_call_operand.vmem [shape: f32[32,128], index: 0, kind: input, shape index: {}]   ;;  %s3076_s1 = inlined_call_operand.vmem [shape: f32[2,32,32], index: 1, kind: input, shape index: {}]   ;;  %s3077_s2 = inlined_call_operand.vmem [shape: f32[32,3], index: 2, kind: input, shape index: {}]   ;;  %s3078_s3 = inlined_call_operand.vmem [shape: f32[108,686], index: 3, kind: input, shape index: {}]   ;;  %s3079_s4 = inlined_call_operand.<no memory space> [shape: f32[], index: 4, kind: input, shape index: {}]   ;;  %s3080_s5 = inlined_call_operand.vmem [shape: f32[32,768], index: 5, kind: output, shape index: {}]  }
   0x1   :  { %v2435_v0 = vstv %s3079_s4  ;;  %v2298_v3 = vld [vmem:[%s3078_s3 + $0x270] sm:$0xff]  ;;  %v2299_v5 = vld [vmem:[%s3078_s3 + $0x278] sm:$0xff]  ;;  %v2300_v6 = vld [vmem:[%s3078_s3 + $0x280] sm:$0xff] }
   0x2   :  { %1533 = vmatpush.msra.mxu0 %v2435_v0  ;;  %1562 = vmatpush.msra.mxu1 %v2435_v0  ;;  %v1268_v2 = vshrl.u32 %v104_v1, 7  ;;  %v2301_v7 = vld [vmem:[%s3078_s3 + $0x288] sm:$0xff]  ;;  %v2292_v12 = vld [vmem:[%s3078_s3 + $0x240] sm:$0xff]  ;;  %v2294_v14 = vld [vmem:[%s3078_s3 + $0x250] sm:$0xff]  ;;  %v105_v58 = vand.u32 127, %v104_v1 }
   0x3   :  { %1591 = vmatpush.msra.mxu2 %v2435_v0  ;;  %1620 = vmatpush.msra.mxu3 %v2435_v0  ;;  %v2293_v13 = vld [vmem:[%s3078_s3 + $0x248] sm:$0xff]  ;;  %v2295_v15 = vld [vmem:[%s3078_s3 + $0x258] sm:$0xff]  ;;  %v2286_v16 = vld [vmem:[%s3078_s3 + $0x210] sm:$0xff] }
   0x4   :  { %1534 = vmatpush.msra.mxu0 %v2435_v0  ;;  %1563 = vmatpush.msra.mxu1 %v2435_v0  ;;  %v2449_v4 = vadd.s32 104, %v1268_v2  ;;  %v2287_v17 = vld [vmem:[%s3078_s3 + $0x218] sm:$0xff]  ;;  %v2288_v18 = vld [vmem:[%s3078_s3 + $0x220] sm:$0xff]  ;;  %v2289_v19 = vld [vmem:[%s3078_s3 + $0x228] sm:$0xff] }
   0x5   :  { %1592 = vmatpush.msra.mxu2 %v2435_v0  ;;  %1621 = vmatpush.msra.mxu3 %v2435_v0  ;;  %v2280_v20 = vld [vmem:[%s3078_s3 + $0x1e0] sm:$0xff]  ;;  %v2281_v21 = vld [vmem:[%s3078_s3 + $0x1e8] sm:$0xff]  ;;  %v2282_v22 = vld [vmem:[%s3078_s3 + $0x1f0] sm:$0xff] }
   0x6   :  { %vm1270_vm0 = vcmp.lt.s32.totalorder %v2449_v4, 108  ;;  %v2283_v23 = vld [vmem:[%s3078_s3 + $0x1f8] sm:$0xff]  ;;  %v2274_v24 = vld [vmem:[%s3078_s3 + $0x1b0] sm:$0xff]  ;;  %v2276_v26 = vld [vmem:[%s3078_s3 + $0x1c0] sm:$0xff] }
   0x7   :  { %v1271_v8 = vsel %vm1270_vm0, %v2298_v3, %v2435_v0  ;;  %v1287_v9 = vsel %vm1270_vm0, %v2299_v5, %v2435_v0  ;;  %v1303_v10 = vsel %vm1270_vm0, %v2300_v6, %v2435_v0  ;;  %v1319_v11 = vsel %vm1270_vm0, %v2301_v7, %v2435_v0  ;;  %v2275_v25 = vld [vmem:[%s3078_s3 + $0x1b8] sm:$0xff]  ;;  %v2277_v27 = vld [vmem:[%s3078_s3 + $0x1c8] sm:$0xff]  ;;  %v2268_v28 = vld [vmem:[%s3078_s3 + $0x180] sm:$0xff] }
   0x8   :  { %1535 = vmatpush.msra.mxu0 %v1271_v8  ;;  %1564 = vmatpush.msra.mxu1 %v1287_v9  ;;  %v2269_v29 = vld [vmem:[%s3078_s3 + $0x188] sm:$0xff]  ;;  %v2270_v30 = vld [vmem:[%s3078_s3 + $0x190] sm:$0xff]  ;;  %v2271_v31 = vld [vmem:[%s3078_s3 + $0x198] sm:$0xff]  ;;  %v2635_v3 = vadd.s32 640, %v105_v58  ;;  %v2399_v9 = vmov 0  }
   0x9   :  { %1593 = vmatpush.msra.mxu2 %v1303_v10  ;;  %1622 = vmatpush.msra.mxu3 %v1319_v11  ;;  %v2262_v32 = vld [vmem:[%s3078_s3 + $0x150] sm:$0xff]  ;;  %v2263_v33 = vld [vmem:[%s3078_s3 + $0x158] sm:$0xff]  ;;  %v2264_v34 = vld [vmem:[%s3078_s3 + $0x160] sm:$0xff] }
   0xa   :  { %1536 = vmatpush.msra.mxu0 %v2292_v12  ;;  %1565 = vmatpush.msra.mxu1 %v2293_v13  ;;  %v2265_v35 = vld [vmem:[%s3078_s3 + $0x168] sm:$0xff]  ;;  %v2256_v36 = vld [vmem:[%s3078_s3 + $0x120] sm:$0xff]  ;;  %v2258_v38 = vld [vmem:[%s3078_s3 + $0x130] sm:$0xff]  ;;  %vm107_vm1 = vcmp.lt.s32.totalorder %v2635_v3, 686 }
   0xb   :  { %1594 = vmatpush.msra.mxu2 %v2294_v14  ;;  %1623 = vmatpush.msra.mxu3 %v2295_v15  ;;  %v2257_v37 = vld [vmem:[%s3078_s3 + $0x128] sm:$0xff]  ;;  %v2259_v39 = vld [vmem:[%s3078_s3 + $0x138] sm:$0xff]  ;;  %v2250_v40 = vld [vmem:[%s3078_s3 + $0xf0] sm:$0xff] }
   0xc   :  { %1537 = vmatpush.msra.mxu0 %v2286_v16  ;;  %1566 = vmatpush.msra.mxu1 %v2287_v17  ;;  %v2251_v41 = vld [vmem:[%s3078_s3 + $0xf8] sm:$0xff]  ;;  %v2252_v42 = vld [vmem:[%s3078_s3 + $0x100] sm:$0xff]  ;;  %v2253_v43 = vld [vmem:[%s3078_s3 + $0x108] sm:$0xff] }
   0xd   :  { %1595 = vmatpush.msra.mxu2 %v2288_v18  ;;  %1624 = vmatpush.msra.mxu3 %v2289_v19  ;;  %v2244_v44 = vld [vmem:[%s3078_s3 + $0xc0] sm:$0xff]  ;;  %v2245_v45 = vld [vmem:[%s3078_s3 + $0xc8] sm:$0xff]  ;;  %v2246_v46 = vld [vmem:[%s3078_s3 + $0xd0] sm:$0xff] }
   0xe   :  { %1538 = vmatpush.msra.mxu0 %v2280_v20  ;;  %1567 = vmatpush.msra.mxu1 %v2281_v21  ;;  %v2247_v47 = vld [vmem:[%s3078_s3 + $0xd8] sm:$0xff]  ;;  %v2238_v48 = vld [vmem:[%s3078_s3 + $0x90] sm:$0xff]  ;;  %v2240_v50 = vld [vmem:[%s3078_s3 + $0xa0] sm:$0xff] }
   0xf   :  { %1596 = vmatpush.msra.mxu2 %v2282_v22  ;;  %1625 = vmatpush.msra.mxu3 %v2283_v23  ;;  %v2239_v49 = vld [vmem:[%s3078_s3 + $0x98] sm:$0xff]  ;;  %v2241_v51 = vld [vmem:[%s3078_s3 + $0xa8] sm:$0xff]  ;;  %v2232_v52 = vld [vmem:[%s3078_s3 + $0x60] sm:$0xff] }
  0x10   :  { %1539 = vmatpush.msra.mxu0 %v2274_v24  ;;  %1568 = vmatpush.msra.mxu1 %v2275_v25  ;;  %v2233_v53 = vld [vmem:[%s3078_s3 + $0x68] sm:$0xff]  ;;  %v2234_v54 = vld [vmem:[%s3078_s3 + $0x70] sm:$0xff]  ;;  %v2235_v55 = vld [vmem:[%s3078_s3 + $0x78] sm:$0xff] }
  0x11   :  { %1597 = vmatpush.msra.mxu2 %v2276_v26  ;;  %1626 = vmatpush.msra.mxu3 %v2277_v27  ;;  %v2226_v56 = vld [vmem:[%s3078_s3 + $0x30] sm:$0xff]  ;;  %v2227_v57 = vld [vmem:[%s3078_s3 + $0x38] sm:$0xff]  ;;  %v2228_v59 = vld [vmem:[%s3078_s3 + $0x40] sm:$0xff] }
  0x12   :  { %1540 = vmatpush.msra.mxu0 %v2268_v28  ;;  %1569 = vmatpush.msra.mxu1 %v2269_v29  ;;  %v2229_v60 = vld [vmem:[%s3078_s3 + $0x48] sm:$0xff]  ;;  %v19_v61 = vld [vmem:[%s3078_s3] sm:$0xff]  ;;  %v2222_v63 = vld [vmem:[%s3078_s3 + $0x10] sm:$0xff] }
  0x13   :  { %1598 = vmatpush.msra.mxu2 %v2270_v30  ;;  %1627 = vmatpush.msra.mxu3 %v2271_v31  ;;  %v2221_v62 = vld [vmem:[%s3078_s3 + $0x8] sm:$0xff]  ;;  %v2223_v1 = vld [vmem:[%s3078_s3 + $0x18] sm:$0xff]  ;;  %v2633_v2 = vld [vmem:[%s3075_s0] sm:$0xff] }
  0x14   :  { %1541 = vmatpush.msra.mxu0 %v2262_v32  ;;  %1570 = vmatpush.msra.mxu1 %v2263_v33  ;;  %v2303_v5 = vld [vmem:[%s3078_s3 + $0x298] sm:$0xff]  ;;  %v2302_v6 = vld [vmem:[%s3078_s3 + $0x290] sm:$0xff]  ;;  %v2653_v7 = vld [vmem:[%s3077_s2 + $0x8] sm:$0xff] }
  0x15   :  { %1599 = vmatpush.msra.mxu2 %v2264_v34  ;;  %1628 = vmatpush.msra.mxu3 %v2265_v35  ;;  %v1351_v8 = vsel %vm1270_vm0, %v2303_v5, %v2435_v0  ;;  %v1335_v10 = vsel %vm1270_vm0, %v2302_v6, %v2435_v0  ;;  %v2297_v11 = vld [vmem:[%s3078_s3 + $0x268] sm:$0xff]  ;;  %v2296_v4 = vld [vmem:[%s3078_s3 + $0x260] sm:$0xff]  ;;  %v2291_v15 = vld [vmem:[%s3078_s3 + $0x238] sm:$0xff] }
  0x16   :  { %1542 = vmatpush.msra.mxu0 %v2256_v36  ;;  %1571 = vmatpush.msra.mxu1 %v2257_v37  ;;  %v1356_v12 = vsel %vm107_vm1, %v1351_v8, %v2435_v0  ;;  %v1260_v13 = vsel %vm107_vm1, %v2297_v11, %v2435_v0  ;;  %v2684_v14 = vld [vmem:[%s3075_s0 + $0x8] sm:$0xff]  ;;  %v2290_v16 = vld [vmem:[%s3078_s3 + $0x230] sm:$0xff]  ;;  %v1164_v18 = vsel %vm107_vm1, %v2291_v15, %v2435_v0  ;;  %v2705_v19 = vld [vmem:[%s3077_s2] sm:$0xff] }
  0x17   :  { %1600 = vmatpush.msra.mxu2 %v2258_v38  ;;  %1629 = vmatpush.msra.mxu3 %v2259_v39  ;;  %v2285_v17 = vld [vmem:[%s3078_s3 + $0x208] sm:$0xff]  ;;  %v2284_v20 = vld [vmem:[%s3078_s3 + $0x200] sm:$0xff]  ;;  %v2279_v21 = vld [vmem:[%s3078_s3 + $0x1d8] sm:$0xff] }
  0x18   :  { %1543 = vmatpush.msra.mxu0 %v2250_v40  ;;  %1572 = vmatpush.msra.mxu1 %v2251_v41  ;;  %v1068_v22 = vsel %vm107_vm1, %v2285_v17, %v2435_v0  ;;  %v2278_v23 = vld [vmem:[%s3078_s3 + $0x1d0] sm:$0xff]  ;;  %v2273_v24 = vld [vmem:[%s3078_s3 + $0x1a8] sm:$0xff]  ;;  %v972_v25 = vsel %vm107_vm1, %v2279_v21, %v2435_v0  ;;  %v2272_v26 = vld [vmem:[%s3078_s3 + $0x1a0] sm:$0xff] }
  0x19   :  { %1601 = vmatpush.msra.mxu2 %v2252_v42  ;;  %1630 = vmatpush.msra.mxu3 %v2253_v43  ;;  %v876_v27 = vsel %vm107_vm1, %v2273_v24, %v2435_v0  ;;  %v2735_v28 = vld [vmem:[%s3075_s0 + $0x10] sm:$0xff]  ;;  %v2267_v29 = vld [vmem:[%s3078_s3 + $0x178] sm:$0xff]  ;;  %v2261_v32 = vld [vmem:[%s3078_s3 + $0x148] sm:$0xff] }
  0x1a   :  { %1544 = vmatpush.msra.mxu0 %v2244_v44  ;;  %1573 = vmatpush.msra.mxu1 %v2245_v45  ;;  %v2266_v30 = vld [vmem:[%s3078_s3 + $0x170] sm:$0xff]  ;;  %v780_v31 = vsel %vm107_vm1, %v2267_v29, %v2435_v0  ;;  %v2756_v33 = vld [vmem:[%s3077_s2 + $0x18] sm:$0xff]  ;;  %v2260_v34 = vld [vmem:[%s3078_s3 + $0x140] sm:$0xff]  ;;  %v684_v36 = vsel %vm107_vm1, %v2261_v32, %v2435_v0 }
  0x1b   :  { %1602 = vmatpush.msra.mxu2 %v2246_v46  ;;  %1631 = vmatpush.msra.mxu3 %v2247_v47  ;;  %v2255_v35 = vld [vmem:[%s3078_s3 + $0x118] sm:$0xff]  ;;  %v2254_v37 = vld [vmem:[%s3078_s3 + $0x110] sm:$0xff]  ;;  %v2249_v38 = vld [vmem:[%s3078_s3 + $0xe8] sm:$0xff] }
  0x1c   :  { %1545 = vmatpush.msra.mxu0 %v2238_v48  ;;  %1574 = vmatpush.msra.mxu1 %v2239_v49  ;;  %v588_v39 = vsel %vm107_vm1, %v2255_v35, %v2435_v0  ;;  %v2248_v40 = vld [vmem:[%s3078_s3 + $0xe0] sm:$0xff]  ;;  %v492_v41 = vsel %vm107_vm1, %v2249_v38, %v2435_v0  ;;  %v1416_v42 = vld [vmem:[%s3075_s0 + $0x18] sm:$0xff]  ;;  %v2242_v44 = vld [vmem:[%s3078_s3 + $0xb0] sm:$0xff] }
  0x1d   :  { %1603 = vmatpush.msra.mxu2 %v2240_v50  ;;  %1632 = vmatpush.msra.mxu3 %v2241_v51  ;;  %v2243_v43 = vld [vmem:[%s3078_s3 + $0xb8] sm:$0xff]  ;;  %v2237_v46 = vld [vmem:[%s3078_s3 + $0x88] sm:$0xff]  ;;  %v2802_v47 = vld [vmem:[%s3077_s2 + $0x10] sm:$0xff] }
  0x1e   :  { %1546 = vmatpush.msra.mxu0 %v2232_v52  ;;  %1575 = vmatpush.msra.mxu1 %v2233_v53  ;;  %v396_v45 = vsel %vm107_vm1, %v2243_v43, %v2435_v0  ;;  %v2236_v48 = vld [vmem:[%s3078_s3 + $0x80] sm:$0xff]  ;;  %v2231_v49 = vld [vmem:[%s3078_s3 + $0x58] sm:$0xff]  ;;  %v300_v50 = vsel %vm107_vm1, %v2237_v46, %v2435_v0  ;;  %v2230_v51 = vld [vmem:[%s3078_s3 + $0x50] sm:$0xff] }
  0x1f   :  { %1604 = vmatpush.msra.mxu2 %v2234_v54  ;;  %1633 = vmatpush.msra.mxu3 %v2235_v55  ;;  %v2225_v52 = vld [vmem:[%s3078_s3 + $0x28] sm:$0xff]  ;;  %v204_v53 = vsel %vm107_vm1, %v2231_v49, %v2435_v0  ;;  %v2224_v54 = vld [vmem:[%s3078_s3 + $0x20] sm:$0xff] }
  0x20   :  { %1547 = vmatpush.msra.mxu0 %v2226_v56  ;;  %1576 = vmatpush.msra.mxu1 %v2227_v57  ;;  %v108_v55 = vsel %vm107_vm1, %v2225_v52, %v2435_v0  ;;  %v2862_v38 = vld [vmem:[%s3076_s1] sm:$0xff] }
  0x21   :  { %1605 = vmatpush.msra.mxu2 %v2228_v59  ;;  %1634 = vmatpush.msra.mxu3 %v2229_v60 }
  0x22   :  { %1548 = vmatpush.msra.mxu0 %v19_v61  ;;  %1577 = vmatpush.msra.mxu1 %v2221_v62 }
  0x23   :  { %1606 = vmatpush.msra.mxu2 %v2222_v63  ;;  %1635 = vmatpush.msra.mxu3 %v2223_v1 }
  0x24   :  { %1549 = vmatmul.f32.vlgmr.msra.gmra.mxu0 %v2633_v2  ;;  %1578 = vmatmul.f32.vlgmr.msra.gmra.mxu1 %v2633_v2 }
  0x25   :  { %1607 = vmatmul.f32.vlgmr.msra.gmra.mxu2 %v2633_v2  ;;  %1636 = vmatmul.f32.vlgmr.msra.gmra.mxu3 %v2633_v2 }
  0x26   :  { %1649 = vmatpush.msrb.mxu0 %v2435_v0  ;;  %2356 = vmatpush.msrb.mxu2 %v2435_v0 }
  0x27   :  { %1678 = vmatpush.msrb.mxu1 %v2435_v0  ;;  %2372 = vmatpush.msrb.mxu3 %v2435_v0 }
  0x28   :  { %2392 = vset.pattern.permute.xlu1 %v2399_v9  ;;  %1650 = vmatpush.msrb.mxu0 %v2435_v0 }
  0x29   :  { %1520 = vperm.xlu1 %2392, %v2653_v7   ;;  %2357 = vmatpush.msrb.mxu2 %v2435_v0 }
  0x2a   :  { %1679 = vmatpush.msrb.mxu1 %v2435_v0  ;;  %2373 = vmatpush.msrb.mxu3 %v2435_v0 }
  0x2b   :  { %1651 = vmatpush.msrb.mxu0 %v1335_v10  ;;  %2358 = vmatpush.msrb.mxu2 %v1335_v10  ;;  %v2400_v10 = vmov 1  }
  0x2c   :  { %1680 = vmatpush.msrb.mxu1 %v1356_v12  ;;  %2374 = vmatpush.msrb.mxu3 %v1356_v12 }
  0x2d   :  { %1652 = vmatpush.msrb.mxu0 %v2296_v4  ;;  %2359 = vmatpush.msrb.mxu2 %v2296_v4 }
  0x2e   :  { %1681 = vmatpush.msrb.mxu1 %v1260_v13  ;;  %2375 = vmatpush.msrb.mxu3 %v1260_v13 }
  0x2f   :  { %1552 = vmatmul.f32.gmra.mxu0 %v2684_v14  ;;  %1581 = vmatmul.f32.gmra.mxu1 %v2684_v14 }
  0x30   :  { %1610 = vmatmul.f32.gmra.mxu2 %v2684_v14  ;;  %1639 = vmatmul.f32.gmra.mxu3 %v2684_v14 }
  0x31   :  { %1653 = vmatpush.msrb.mxu0 %v2290_v16  ;;  %2360 = vmatpush.msrb.mxu2 %v2290_v16 }
  0x32   :  { %1682 = vmatpush.msrb.mxu1 %v1164_v18  ;;  %2376 = vmatpush.msrb.mxu3 %v1164_v18 }
  0x33   :  { %1515 = vperm.xlu1 %2392, %v2705_v19   ;;  %1654 = vmatpush.msrb.mxu0 %v2284_v20 }
  0x34   :  { %2361 = vmatpush.msrb.mxu2 %v2284_v20  ;;  %1683 = vmatpush.msrb.mxu1 %v1068_v22 }
  0x35   :  { %2377 = vmatpush.msrb.mxu3 %v1068_v22  ;;  %1655 = vmatpush.msrb.mxu0 %v2278_v23 }
  0x36   :  { %2362 = vmatpush.msrb.mxu2 %v2278_v23  ;;  %1684 = vmatpush.msrb.mxu1 %v972_v25 }
  0x37   :  { %2378 = vmatpush.msrb.mxu3 %v972_v25  ;;  %1656 = vmatpush.msrb.mxu0 %v2272_v26 }
  0x38   :  { %2363 = vmatpush.msrb.mxu2 %v2272_v26  ;;  %1685 = vmatpush.msrb.mxu1 %v876_v27 }
  0x39   :  { %2379 = vmatpush.msrb.mxu3 %v876_v27  ;;  %1555 = vmatmul.f32.gmra.mxu0 %v2735_v28 }
  0x3a   :  { %1584 = vmatmul.f32.gmra.mxu1 %v2735_v28  ;;  %1613 = vmatmul.f32.gmra.mxu2 %v2735_v28 }
  0x3b   :  { %1642 = vmatmul.f32.gmra.mxu3 %v2735_v28  ;;  %1657 = vmatpush.msrb.mxu0 %v2266_v30 }
  0x3c   :  { %2364 = vmatpush.msrb.mxu2 %v2266_v30  ;;  %1686 = vmatpush.msrb.mxu1 %v780_v31 }
  0x3d   :  { %2380 = vmatpush.msrb.mxu3 %v780_v31  ;;  %2391 = vset.pattern.permute.xlu0 %v2399_v9 }
  0x3e   :  { %1530 = vperm.xlu0 %2391, %v2756_v33   ;;  %1658 = vmatpush.msrb.mxu0 %v2260_v34 }
  0x3f   :  { %2365 = vmatpush.msrb.mxu2 %v2260_v34  ;;  %1687 = vmatpush.msrb.mxu1 %v684_v36 }
  0x40   :  { %2381 = vmatpush.msrb.mxu3 %v684_v36  ;;  %1659 = vmatpush.msrb.mxu0 %v2254_v37 }
  0x41   :  { %2366 = vmatpush.msrb.mxu2 %v2254_v37  ;;  %1688 = vmatpush.msrb.mxu1 %v588_v39 }
  0x42   :  { %2382 = vmatpush.msrb.mxu3 %v588_v39  ;;  %1660 = vmatpush.msrb.mxu0 %v2248_v40 }
  0x43   :  { %2367 = vmatpush.msrb.mxu2 %v2248_v40  ;;  %1689 = vmatpush.msrb.mxu1 %v492_v41 }
  0x44   :  { %2383 = vmatpush.msrb.mxu3 %v492_v41  ;;  %1558 = vmatmul.f32.gmra.mxu0 %v1416_v42 }
  0x45   :  { %1587 = vmatmul.f32.gmra.mxu1 %v1416_v42  ;;  %1616 = vmatmul.f32.gmra.mxu2 %v1416_v42 }
  0x46   :  { %1645 = vmatmul.f32.gmra.mxu3 %v1416_v42  ;;  %1661 = vmatpush.msrb.mxu0 %v2242_v44 }
  0x47   :  { %2368 = vmatpush.msrb.mxu2 %v2242_v44  ;;  %1690 = vmatpush.msrb.mxu1 %v396_v45 }
  0x48   :  { %2384 = vmatpush.msrb.mxu3 %v396_v45  ;;  %1525 = vperm.xlu0 %2391, %v2802_v47  }
  0x49   :  { %1662 = vmatpush.msrb.mxu0 %v2236_v48  ;;  %2369 = vmatpush.msrb.mxu2 %v2236_v48 }
  0x4a   :  { %1691 = vmatpush.msrb.mxu1 %v300_v50  ;;  %2385 = vmatpush.msrb.mxu3 %v300_v50 }
  0x4b   :  { %1663 = vmatpush.msrb.mxu0 %v2230_v51  ;;  %2370 = vmatpush.msrb.mxu2 %v2230_v51 }
  0x4c   :  { %1692 = vmatpush.msrb.mxu1 %v204_v53  ;;  %2386 = vmatpush.msrb.mxu3 %v204_v53 }
  0x4d   :  { %1664 = vmatpush.msrb.mxu0 %v2224_v54  ;;  %2371 = vmatpush.msrb.mxu2 %v2224_v54  ;;  %v1732_v54 = vld [vmem:[%s3076_s1 + $0x8] sm:$0xff] }
  0x4e   :  { %1693 = vmatpush.msrb.mxu1 %v108_v55  ;;  %2387 = vmatpush.msrb.mxu3 %v108_v55 }
  0x4f   :  { %1665 = vmatmul.f32.vlgmr.msrb.gmra.mxu0 %v2633_v2  ;;  %1671 = vmatmul.f32.vlgmr.msrb.gmra.mxu2 %v2735_v28 }
  0x50   :  { %1694 = vmatmul.f32.vlgmr.msrb.gmra.mxu1 %v2633_v2  ;;  %1700 = vmatmul.f32.vlgmr.msrb.gmra.mxu3 %v2735_v28 }
  0x51   :  { %2395 = vset.pattern.permute.xlu1 %v2400_v10  ;;  %2394 = vset.pattern.permute.xlu0 %v2400_v10 }
  0x52   :  { %1736 = vperm.xlu1 %2395, %v2705_v19   ;;  %1740 = vperm.xlu0 %2394, %v2653_v7  }
  0x53   :  { %2393 = vset.pattern.permute.xlu2 %v2400_v10 }
  0x54   :  { %1748 = vperm.xlu2 %2393, %v2756_v33  }
  0x57   :  { %1668 = vmatmul.f32.gmra.mxu0 %v2684_v14  ;;  %1674 = vmatmul.f32.gmra.mxu2 %v1416_v42 }
  0x58   :  { %1697 = vmatmul.f32.gmra.mxu1 %v2684_v14  ;;  %1703 = vmatmul.f32.gmra.mxu3 %v1416_v42 }
  0x5c   :  { %1744 = vperm.xlu2 %2393, %v2802_v47  }
  0x9b   :  { %v2837_v3 = vpop.permute.xlu1 %1520 }
  0xa1   :  { %v1550_v0 = vpop.f32.mrf.mxu0  ;;  %v1579_v56 = vpop.f32.mrf.mxu1 }
  0xa5   :  { %v2845_v13 = vpop.permute.xlu1 %1515 }
  0xa6   :  { %v1551_v21 = vadd.f32 %v1550_v0, %v2845_v13  ;;  %v1580_v23 = vadd.f32 %v1579_v56, %v2845_v13 }
  0xa8   :  { %v1608_v57 = vpop.f32.mrf.mxu2  ;;  %v1637_v58 = vpop.f32.mrf.mxu3  ;;  %v1707_v31 = vmax.f32 %v1551_v21, 0.0  ;;  %v1708_v35 = vmax.f32 %v1580_v23, 0.0 }
  0xa9   :  { %v1609_v41 = vadd.f32 %v1608_v57, %v2845_v13  ;;  %v1638_v43 = vadd.f32 %v1637_v58, %v2845_v13 }
  0xab   :  { %v1709_v49 = vmax.f32 %v1609_v41, 0.0  ;;  %v1710_v51 = vmax.f32 %v1638_v43, 0.0  ;;  %v2401_v43 = vmov 2  }
  0xac   :  { %v1553_v59 = vpop.f32.mrf.mxu0  ;;  %v1582_v60 = vpop.f32.mrf.mxu1  ;;  %2397 = vset.pattern.permute.xlu1 %v2401_v43  ;;  %2396 = vset.pattern.permute.xlu2 %v2401_v43 }
  0xad   :  { %v1554_v16 = vadd.f32 %v1553_v59, %v2837_v3  ;;  %v1583_v18 = vadd.f32 %v1582_v60, %v2837_v3  ;;  %v1733_v60 = vld [vmem:[%s3076_s1 + $0x10] sm:$0xff]  ;;  %1972 = vperm.xlu1 %2397, %v2653_v7   ;;  %2398 = vset.pattern.permute.xlu0 %v2401_v43 }
  0xae   :  { %v2915_v23 = vpop.permute.xlu2 %1748  ;;  %1980 = vperm.xlu0 %2398, %v2756_v33   ;;  %1968 = vperm.xlu2 %2396, %v2705_v19  }
  0xaf   :  { %v1713_v25 = vmax.f32 %v1554_v16, 0.0  ;;  %v1714_v27 = vmax.f32 %v1583_v18, 0.0 }
  0xb0   :  { %v2835_v62 = vpop.permute.xlu0 %1530 }
  0xb3   :  { %v1611_v61 = vpop.f32.mrf.mxu2  ;;  %v1640_v63 = vpop.f32.mrf.mxu3 }
  0xb4   :  { %v1612_v36 = vadd.f32 %v1611_v61, %v2837_v3  ;;  %v1641_v39 = vadd.f32 %v1640_v63, %v2837_v3 }
  0xb6   :  { %v1556_v1 = vpop.f32.mrf.mxu0  ;;  %v1715_v45 = vmax.f32 %v1612_v36, 0.0  ;;  %v1716_v46 = vmax.f32 %v1641_v39, 0.0  ;;  %1976 = vperm.xlu2 %2396, %v2802_v47   ;;  %v2330_v47 = vld [vmem:[%s3076_s1 + $0x30] sm:$0xff] }
  0xb7   :  { %v1585_v2 = vpop.f32.mrf.mxu1 }
  0xba   :  { %v2839_v6 = vpop.permute.xlu0 %1525 }
  0xbb   :  { %v1557_v11 = vadd.f32 %v1556_v1, %v2839_v6  ;;  %v1586_v14 = vadd.f32 %v1585_v2, %v2839_v6 }
  0xbd   :  { %v1614_v5 = vpop.f32.mrf.mxu2  ;;  %v1719_v22 = vmax.f32 %v1557_v11, 0.0  ;;  %v1720_v24 = vmax.f32 %v1586_v14, 0.0 }
  0xbe   :  { %v1643_v8 = vpop.f32.mrf.mxu3  ;;  %v1615_v28 = vadd.f32 %v1614_v5, %v2839_v6 }
  0xbf   :  { %v1644_v32 = vadd.f32 %v1643_v8, %v2839_v6 }
  0xc0   :  { %v1721_v42 = vmax.f32 %v1615_v28, 0.0  ;;  %v2917_v28 = vpop.permute.xlu2 %1744 }
  0xc1   :  { %v1559_v9 = vpop.f32.mrf.mxu0  ;;  %v1722_v44 = vmax.f32 %v1644_v32, 0.0 }
  0xc2   :  { %v1560_v12 = vadd.f32 %v1559_v9, %v2835_v62  ;;  %v1588_v4 = vpop.f32.mrf.mxu1 }
  0xc3   :  { %v1589_v15 = vadd.f32 %v1588_v4, %v2835_v62 }
  0xc4   :  { %v1725_v17 = vmax.f32 %v1560_v12, 0.0 }
  0xc5   :  { %v1726_v20 = vmax.f32 %v1589_v15, 0.0 }
  0xc6   :  { %1776 = vmatpush.msra.mxu2 %v1725_v17 }
  0xc7   :  { %1805 = vmatpush.msra.mxu3 %v1726_v20 }
  0xc8   :  { %v1617_v26 = vpop.f32.mrf.mxu2  ;;  %1777 = vmatpush.msra.mxu2 %v1719_v22 }
  0xc9   :  { %v1618_v29 = vadd.f32 %v1617_v26, %v2835_v62  ;;  %v1646_v30 = vpop.f32.mrf.mxu3  ;;  %1806 = vmatpush.msra.mxu3 %v1720_v24 }
  0xca   :  { %v1647_v34 = vadd.f32 %v1646_v30, %v2835_v62  ;;  %1778 = vmatpush.msra.mxu2 %v1713_v25  ;;  %v2921_v30 = vpop.permute.xlu1 %1736 }
  0xcb   :  { %v1727_v37 = vmax.f32 %v1618_v29, 0.0  ;;  %1807 = vmatpush.msra.mxu3 %v1714_v27  ;;  %v2919_v29 = vpop.permute.xlu0 %1740 }
  0xcc   :  { %v1728_v40 = vmax.f32 %v1647_v34, 0.0  ;;  %1779 = vmatpush.msra.mxu2 %v1707_v31  ;;  %v1666_v48 = vpop.f32.mrf.mxu0 }
  0xcd   :  { %1808 = vmatpush.msra.mxu3 %v1708_v35  ;;  %1834 = vmatpush.msra.mxu0 %v1727_v37  ;;  %v1695_v50 = vpop.f32.mrf.mxu1  ;;  %v1667_v9 = vadd.f32 %v1666_v48, %v2845_v13 }
  0xce   :  { %1863 = vmatpush.msra.mxu1 %v1728_v40  ;;  %2304 = vmatmul.msk.f32.vlgmr.msra.gmra.mxu2 %vm1751_vm2, %v2862_v38 }
  0xcf   :  { %2308 = vmatmul.msk.f32.vlgmr.msra.gmra.mxu3 %vm1751_vm2, %v2862_v38  ;;  %1835 = vmatpush.msra.mxu0 %v1721_v42  ;;  %v1711_v4 = vmax.f32 %v1667_v9, 0.0 }
  0xd0   :  { %1864 = vmatpush.msra.mxu1 %v1722_v44 }
  0xd1   :  { %1836 = vmatpush.msra.mxu0 %v1715_v45 }
  0xd2   :  { %v1672_v52 = vpop.f32.mrf.mxu2  ;;  %1865 = vmatpush.msra.mxu1 %v1716_v46 }
  0xd3   :  { %v1701_v53 = vpop.f32.mrf.mxu3  ;;  %1837 = vmatpush.msra.mxu0 %v1709_v49  ;;  %v1673_v56 = vadd.f32 %v1672_v52, %v2839_v6 }
  0xd4   :  { %1866 = vmatpush.msra.mxu1 %v1710_v51  ;;  %2312 = vmatmul.msk.f32.vlgmr.msra.gmra.mxu0 %vm1751_vm2, %v2862_v38  ;;  %v1669_v55 = vpop.f32.mrf.mxu0  ;;  %v1702_v61 = vadd.f32 %v1701_v53, %v2839_v6 }
  0xd5   :  { %2316 = vmatmul.msk.f32.vlgmr.msra.gmra.mxu1 %vm1751_vm2, %v2862_v38  ;;  %v1698_v57 = vpop.f32.mrf.mxu1  ;;  %v1670_v1 = vadd.f32 %v1669_v55, %v2837_v3  ;;  %v1723_v10 = vmax.f32 %v1673_v56, 0.0 }
  0xd6   :  { %2305 = vmatmul.msk.f32.gmra.mxu2 %vm1751_vm2, %v1732_v54  ;;  %v1699_v5 = vadd.f32 %v1698_v57, %v2837_v3  ;;  %v1724_v6 = vmax.f32 %v1702_v61, 0.0  ;;  %v1734_v3 = vld [vmem:[%s3076_s1 + $0x18] sm:$0xff] }
  0xd7   :  { %2309 = vmatmul.msk.f32.gmra.mxu3 %vm1751_vm2, %v1732_v54  ;;  %v1717_v11 = vmax.f32 %v1670_v1, 0.0 }
  0xd8   :  { %v1718_v12 = vmax.f32 %v1699_v5, 0.0 }
  0xda   :  { %v1675_v0 = vpop.f32.mrf.mxu2 }
  0xdb   :  { %v1676_v58 = vadd.f32 %v1675_v0, %v2835_v62  ;;  %v1704_v59 = vpop.f32.mrf.mxu3 }
  0xdc   :  { %v1705_v63 = vadd.f32 %v1704_v59, %v2835_v62  ;;  %2313 = vmatmul.msk.f32.gmra.mxu0 %vm1751_vm2, %v1732_v54  ;;  %v1696_v62 = vadd.f32 %v1695_v50, %v2845_v13 }
  0xdd   :  { %v1729_v2 = vmax.f32 %v1676_v58, 0.0  ;;  %2317 = vmatmul.msk.f32.gmra.mxu1 %vm1751_vm2, %v1732_v54 }
  0xde   :  { %v1730_v8 = vmax.f32 %v1705_v63, 0.0  ;;  %2306 = vmatmul.msk.f32.gmra.mxu2 %vm1751_vm2, %v1733_v60  ;;  %v1712_v14 = vmax.f32 %v1696_v62, 0.0 }
  0xdf   :  { %1892 = vmatpush.msrb.mxu2 %v1729_v2  ;;  %2310 = vmatmul.msk.f32.gmra.mxu3 %vm1751_vm2, %v1733_v60 }
  0xe0   :  { %1921 = vmatpush.msrb.mxu3 %v1730_v8 }
  0xe1   :  { %1893 = vmatpush.msrb.mxu2 %v1723_v10  ;;  %v2328_v10 = vld [vmem:[%s3076_s1 + $0x20] sm:$0xff] }
  0xe2   :  { %1922 = vmatpush.msrb.mxu3 %v1724_v6 }
  0xe3   :  { %1894 = vmatpush.msrb.mxu2 %v1717_v11  ;;  %v2329_v11 = vld [vmem:[%s3076_s1 + $0x28] sm:$0xff] }
  0xe4   :  { %1923 = vmatpush.msrb.mxu3 %v1718_v12  ;;  %2314 = vmatmul.msk.f32.gmra.mxu0 %vm1751_vm2, %v1733_v60 }
  0xe5   :  { %1895 = vmatpush.msrb.mxu2 %v1711_v4  ;;  %2318 = vmatmul.msk.f32.gmra.mxu1 %vm1751_vm2, %v1733_v60 }
  0xe6   :  { %1924 = vmatpush.msrb.mxu3 %v1712_v14  ;;  %2307 = vmatmul.msk.f32.gmra.mxu2 %vm1751_vm2, %v1734_v3 }
  0xe7   :  { %2311 = vmatmul.msk.f32.gmra.mxu3 %vm1751_vm2, %v1734_v3 }
  0xec   :  { %2315 = vmatmul.msk.f32.gmra.mxu0 %vm1751_vm2, %v1734_v3 }
  0xed   :  { %2319 = vmatmul.msk.f32.gmra.mxu1 %vm1751_vm2, %v1734_v3 }
  0xee   :  { %2320 = vmatmul.msk.f32.vlgmr.msrb.gmra.mxu2 %vm1751_vm2, %v2862_v38 }
  0xef   :  { %2324 = vmatmul.msk.f32.vlgmr.msrb.gmra.mxu3 %vm1751_vm2, %v2862_v38 }
  0xf6   :  { %2321 = vmatmul.msk.f32.gmra.mxu2 %vm1751_vm2, %v1732_v54 }
  0xf7   :  { %2325 = vmatmul.msk.f32.gmra.mxu3 %vm1751_vm2, %v1732_v54 }
  0xfe   :  { %2322 = vmatmul.msk.f32.gmra.mxu2 %vm1751_vm2, %v1733_v60 }
  0xff   :  { %2326 = vmatmul.msk.f32.gmra.mxu3 %vm1751_vm2, %v1733_v60 }
 0x106   :  { %2323 = vmatmul.msk.f32.gmra.mxu2 %vm1751_vm2, %v1734_v3 }
 0x107   :  { %2327 = vmatmul.msk.f32.gmra.mxu3 %vm1751_vm2, %v1734_v3 }
 0x151   :  { %v1781_v13 = vpop.f32.mrf.mxu2  ;;  %v1839_v15 = vpop.f32.mrf.mxu0 }
 0x152   :  { %v1810_v16 = vpop.f32.mrf.mxu3  ;;  %v1868_v17 = vpop.f32.mrf.mxu1  ;;  %v1782_v48 = vadd.f32 %v1781_v13, %v2921_v30  ;;  %v1840_v52 = vadd.f32 %v1839_v15, %v2921_v30 }
 0x153   :  { %v1811_v0 = vadd.f32 %v1810_v16, %v2921_v30  ;;  %v1869_v58 = vadd.f32 %v1868_v17, %v2921_v30 }
 0x154   :  { %v1938_v1 = vmax.f32 %v1782_v48, 0.0  ;;  %v1940_v2 = vmax.f32 %v1840_v52, 0.0 }
 0x155   :  { %v1939_v8 = vmax.f32 %v1811_v0, 0.0  ;;  %v1941_v9 = vmax.f32 %v1869_v58, 0.0 }
 0x159   :  { %v1784_v18 = vpop.f32.mrf.mxu2  ;;  %v1842_v20 = vpop.f32.mrf.mxu0 }
 0x15a   :  { %v1813_v21 = vpop.f32.mrf.mxu3  ;;  %v1871_v22 = vpop.f32.mrf.mxu1  ;;  %v1843_v31 = vadd.f32 %v1842_v20, %v2919_v29  ;;  %v1785_v49 = vadd.f32 %v1784_v18, %v2919_v29  ;;  %v2331_v18 = vld [vmem:[%s3076_s1 + $0x38] sm:$0xff] }
 0x15b   :  { %v1872_v32 = vadd.f32 %v1871_v22, %v2919_v29  ;;  %v1814_v53 = vadd.f32 %v1813_v21, %v2919_v29 }
 0x15c   :  { %v1946_v7 = vmax.f32 %v1843_v31, 0.0  ;;  %v1944_v19 = vmax.f32 %v1785_v49, 0.0 }
 0x15d   :  { %v1947_v59 = vmax.f32 %v1872_v32, 0.0  ;;  %v1945_v61 = vmax.f32 %v1814_v53, 0.0 }
 0x161   :  { %v1787_v24 = vpop.f32.mrf.mxu2  ;;  %v1845_v25 = vpop.f32.mrf.mxu0 }
 0x162   :  { %v1816_v26 = vpop.f32.mrf.mxu3  ;;  %v1874_v27 = vpop.f32.mrf.mxu1  ;;  %v1788_v34 = vadd.f32 %v1787_v24, %v2917_v28  ;;  %v1846_v35 = vadd.f32 %v1845_v25, %v2917_v28 }
 0x163   :  { %v1817_v38 = vadd.f32 %v1816_v26, %v2917_v28  ;;  %v1875_v44 = vadd.f32 %v1874_v27, %v2917_v28 }
 0x164   :  { %v1950_v56 = vmax.f32 %v1788_v34, 0.0  ;;  %v1952_v57 = vmax.f32 %v1846_v35, 0.0 }
 0x165   :  { %v1951_v60 = vmax.f32 %v1817_v38, 0.0  ;;  %v1953_v33 = vmax.f32 %v1875_v44, 0.0 }
 0x169   :  { %v1790_v36 = vpop.f32.mrf.mxu2  ;;  %v1848_v37 = vpop.f32.mrf.mxu0 }
 0x16a   :  { %v1791_v39 = vadd.f32 %v1790_v36, %v2915_v23  ;;  %v1819_v40 = vpop.f32.mrf.mxu3  ;;  %v1849_v41 = vadd.f32 %v1848_v37, %v2915_v23  ;;  %v1877_v42 = vpop.f32.mrf.mxu1 }
 0x16b   :  { %v1820_v45 = vadd.f32 %v1819_v40, %v2915_v23  ;;  %v1878_v46 = vadd.f32 %v1877_v42, %v2915_v23  ;;  %v2997_v40 = vpop.permute.xlu1 %1972 }
 0x16c   :  { %v1956_v50 = vmax.f32 %v1791_v39, 0.0  ;;  %v1958_v51 = vmax.f32 %v1849_v41, 0.0 }
 0x16d   :  { %v1957_v54 = vmax.f32 %v1820_v45, 0.0  ;;  %v1959_v55 = vmax.f32 %v1878_v46, 0.0 }
 0x16e   :  { %2007 = vmatpush.msrb.mxu0 %v1956_v50  ;;  %2065 = vmatpush.msra.mxu2 %v1958_v51 }
 0x16f   :  { %2036 = vmatpush.msrb.mxu1 %v1957_v54  ;;  %2094 = vmatpush.msra.mxu3 %v1959_v55 }
 0x170   :  { %2008 = vmatpush.msrb.mxu0 %v1950_v56  ;;  %2066 = vmatpush.msra.mxu2 %v1952_v57 }
 0x171   :  { %2037 = vmatpush.msrb.mxu1 %v1951_v60  ;;  %2095 = vmatpush.msra.mxu3 %v1953_v33  ;;  %v1897_v63 = vpop.f32.mrf.mxu2 }
 0x172   :  { %v1926_v5 = vpop.f32.mrf.mxu3  ;;  %2009 = vmatpush.msrb.mxu0 %v1944_v19  ;;  %2067 = vmatpush.msra.mxu2 %v1946_v7  ;;  %v1898_v25 = vadd.f32 %v1897_v63, %v2921_v30 }
 0x173   :  { %2038 = vmatpush.msrb.mxu1 %v1945_v61  ;;  %2096 = vmatpush.msra.mxu3 %v1947_v59  ;;  %v1927_v27 = vadd.f32 %v1926_v5, %v2921_v30  ;;  %v2987_v30 = vpop.permute.xlu2 %1968 }
 0x174   :  { %2010 = vmatpush.msrb.mxu0 %v1938_v1  ;;  %2068 = vmatpush.msra.mxu2 %v1940_v2  ;;  %v1981_v1 = vpop.permute.xlu0 %1980 }
 0x175   :  { %2039 = vmatpush.msrb.mxu1 %v1939_v8  ;;  %2097 = vmatpush.msra.mxu3 %v1941_v9  ;;  %v1943_v32 = vmax.f32 %v1927_v27, 0.0 }
 0x176   :  { %2332 = vmatmul.msk.f32.vlgmr.msrb.gmra.mxu0 %vm1751_vm2, %v2328_v10  ;;  %2336 = vmatmul.msk.f32.vlgmr.msrb.gmra.mxu1 %vm1751_vm2, %v2328_v10 }
 0x177   :  { %2340 = vmatmul.msk.f32.vlgmr.msra.gmra.mxu2 %vm1751_vm2, %v2328_v10  ;;  %2344 = vmatmul.msk.f32.vlgmr.msra.gmra.mxu3 %vm1751_vm2, %v2328_v10 }
 0x179   :  { %v1900_v62 = vpop.f32.mrf.mxu2 }
 0x17a   :  { %v1929_v6 = vpop.f32.mrf.mxu3  ;;  %v1901_v20 = vadd.f32 %v1900_v62, %v2919_v29 }
 0x17b   :  { %v1930_v22 = vadd.f32 %v1929_v6, %v2919_v29  ;;  %v1942_v29 = vmax.f32 %v1898_v25, 0.0  ;;  %v1977_v54 = vpop.permute.xlu2 %1976 }
 0x17d   :  { %v1949_v31 = vmax.f32 %v1930_v22, 0.0 }
 0x17e   :  { %2333 = vmatmul.msk.f32.gmra.mxu0 %vm1751_vm2, %v2329_v11  ;;  %2337 = vmatmul.msk.f32.gmra.mxu1 %vm1751_vm2, %v2329_v11 }
 0x17f   :  { %2341 = vmatmul.msk.f32.gmra.mxu2 %vm1751_vm2, %v2329_v11  ;;  %2345 = vmatmul.msk.f32.gmra.mxu3 %vm1751_vm2, %v2329_v11 }
 0x181   :  { %v1903_v12 = vpop.f32.mrf.mxu2 }
 0x182   :  { %v1932_v4 = vpop.f32.mrf.mxu3  ;;  %v1904_v14 = vadd.f32 %v1903_v12, %v2917_v28 }
 0x183   :  { %v1933_v16 = vadd.f32 %v1932_v4, %v2917_v28 }
 0x184   :  { %v1954_v26 = vmax.f32 %v1904_v14, 0.0 }
 0x185   :  { %v1955_v28 = vmax.f32 %v1933_v16, 0.0 }
 0x186   :  { %2334 = vmatmul.msk.f32.gmra.mxu0 %vm1751_vm2, %v2330_v47  ;;  %2338 = vmatmul.msk.f32.gmra.mxu1 %vm1751_vm2, %v2330_v47 }
 0x187   :  { %2342 = vmatmul.msk.f32.gmra.mxu2 %vm1751_vm2, %v2330_v47  ;;  %2346 = vmatmul.msk.f32.gmra.mxu3 %vm1751_vm2, %v2330_v47 }
 0x189   :  { %v1906_v3 = vpop.f32.mrf.mxu2 }
 0x18a   :  { %v1907_v13 = vadd.f32 %v1906_v3, %v2915_v23  ;;  %v1935_v15 = vpop.f32.mrf.mxu3 }
 0x18b   :  { %v1936_v17 = vadd.f32 %v1935_v15, %v2915_v23  ;;  %v1948_v23 = vmax.f32 %v1901_v20, 0.0 }
 0x18c   :  { %v1960_v21 = vmax.f32 %v1907_v13, 0.0 }
 0x18d   :  { %v1961_v24 = vmax.f32 %v1936_v17, 0.0 }
 0x18e   :  { %2123 = vmatpush.msra.mxu0 %v1960_v21  ;;  %2339 = vmatmul.msk.f32.gmra.mxu1 %vm1751_vm2, %v2331_v18 }
 0x18f   :  { %2152 = vmatpush.msra.mxu1 %v1961_v24  ;;  %2335 = vmatmul.msk.f32.gmra.mxu0 %vm1751_vm2, %v2331_v18 }
 0x190   :  { %2124 = vmatpush.msra.mxu0 %v1954_v26  ;;  %2343 = vmatmul.msk.f32.gmra.mxu2 %vm1751_vm2, %v2331_v18 }
 0x191   :  { %2153 = vmatpush.msra.mxu1 %v1955_v28  ;;  %2347 = vmatmul.msk.f32.gmra.mxu3 %vm1751_vm2, %v2331_v18 }
 0x192   :  { %2125 = vmatpush.msra.mxu0 %v1948_v23 }
 0x193   :  { %2154 = vmatpush.msra.mxu1 %v1949_v31 }
 0x194   :  { %2126 = vmatpush.msra.mxu0 %v1942_v29 }
 0x195   :  { %2155 = vmatpush.msra.mxu1 %v1943_v32 }
 0x196   :  { %2352 = vmatmul.msk.f32.vlgmr.msra.gmra.mxu1 %vm1751_vm2, %v2328_v10 }
 0x197   :  { %2348 = vmatmul.msk.f32.vlgmr.msra.gmra.mxu0 %vm1751_vm2, %v2328_v10 }
 0x19e   :  { %2353 = vmatmul.msk.f32.gmra.mxu1 %vm1751_vm2, %v2329_v11 }
 0x19f   :  { %2349 = vmatmul.msk.f32.gmra.mxu0 %vm1751_vm2, %v2329_v11 }
 0x1a6   :  { %2354 = vmatmul.msk.f32.gmra.mxu1 %vm1751_vm2, %v2330_v47 }
 0x1a7   :  { %2350 = vmatmul.msk.f32.gmra.mxu0 %vm1751_vm2, %v2330_v47 }
 0x1ae   :  { %2355 = vmatmul.msk.f32.gmra.mxu1 %vm1751_vm2, %v2331_v18 }
 0x1af   :  { %2351 = vmatmul.msk.f32.gmra.mxu0 %vm1751_vm2, %v2331_v18 }
 0x1f3   :  { %v2012_v34 = vpop.f32.mrf.mxu0  ;;  %v2041_v35 = vpop.f32.mrf.mxu1 }
 0x1f4   :  { %v2013_v36 = vadd.f32 %v2012_v34, %v2987_v30  ;;  %v2042_v37 = vadd.f32 %v2041_v35, %v2987_v30 }
 0x1f6   :  { %v2169_v38 = vmax.f32 %v2013_v36, 0.0  ;;  %v2170_v39 = vmax.f32 %v2042_v37, 0.0 }
 0x1f8   :  { %2193 = vst [vmem:[%s3080_s5] sm:$0xff] %v2169_v38 }
 0x1f9   :  { %2194 = vst [vmem:[%s3080_s5 + $0x8] sm:$0xff] %v2170_v39 }
 0x1fa   :  { %v2070_v41 = vpop.f32.mrf.mxu2  ;;  %v2099_v42 = vpop.f32.mrf.mxu3 }
 0x1fb   :  { %v2015_v43 = vpop.f32.mrf.mxu0  ;;  %v2044_v44 = vpop.f32.mrf.mxu1  ;;  %v2071_v45 = vadd.f32 %v2070_v41, %v2987_v30  ;;  %v2100_v46 = vadd.f32 %v2099_v42, %v2987_v30 }
 0x1fc   :  { %v2016_v48 = vadd.f32 %v2015_v43, %v2997_v40  ;;  %v2045_v49 = vadd.f32 %v2044_v44, %v2997_v40 }
 0x1fd   :  { %v2171_v50 = vmax.f32 %v2071_v45, 0.0  ;;  %v2172_v53 = vmax.f32 %v2100_v46, 0.0 }
 0x1fe   :  { %v2175_v51 = vmax.f32 %v2016_v48, 0.0  ;;  %v2176_v52 = vmax.f32 %v2045_v49, 0.0 }
 0x1ff   :  { %2195 = vst [vmem:[%s3080_s5 + $0x10] sm:$0xff] %v2171_v50 }
 0x200   :  { %2199 = vst [vmem:[%s3080_s5 + $0x30] sm:$0xff] %v2175_v51 }
 0x201   :  { %2200 = vst [vmem:[%s3080_s5 + $0x38] sm:$0xff] %v2176_v52 }
 0x202   :  { %2196 = vst [vmem:[%s3080_s5 + $0x18] sm:$0xff] %v2172_v53  ;;  %v2073_v55 = vpop.f32.mrf.mxu2  ;;  %v2102_v0 = vpop.f32.mrf.mxu3 }
 0x203   :  { %v2018_v7 = vpop.f32.mrf.mxu0  ;;  %v2047_v56 = vpop.f32.mrf.mxu1  ;;  %v2074_v57 = vadd.f32 %v2073_v55, %v2997_v40  ;;  %v2103_v58 = vadd.f32 %v2102_v0, %v2997_v40 }
 0x204   :  { %v2019_v59 = vadd.f32 %v2018_v7, %v1977_v54  ;;  %v2048_v60 = vadd.f32 %v2047_v56, %v1977_v54 }
 0x205   :  { %v2177_v33 = vmax.f32 %v2074_v57, 0.0  ;;  %v2178_v63 = vmax.f32 %v2103_v58, 0.0 }
 0x206   :  { %v2181_v19 = vmax.f32 %v2019_v59, 0.0  ;;  %v2182_v61 = vmax.f32 %v2048_v60, 0.0 }
 0x207   :  { %2201 = vst [vmem:[%s3080_s5 + $0x40] sm:$0xff] %v2177_v33 }
 0x208   :  { %2205 = vst [vmem:[%s3080_s5 + $0x60] sm:$0xff] %v2181_v19 }
 0x209   :  { %2206 = vst [vmem:[%s3080_s5 + $0x68] sm:$0xff] %v2182_v61 }
 0x20a   :  { %2202 = vst [vmem:[%s3080_s5 + $0x48] sm:$0xff] %v2178_v63  ;;  %v2076_v2 = vpop.f32.mrf.mxu2  ;;  %v2105_v5 = vpop.f32.mrf.mxu3 }
 0x20b   :  { %v2050_v8 = vpop.f32.mrf.mxu1  ;;  %v2077_v9 = vadd.f32 %v2076_v2, %v1977_v54  ;;  %v2106_v10 = vadd.f32 %v2105_v5, %v1977_v54 }
 0x20c   :  { %v2021_v62 = vpop.f32.mrf.mxu0  ;;  %v2051_v6 = vadd.f32 %v2050_v8, %v1981_v1 }
 0x20d   :  { %v2022_v11 = vadd.f32 %v2021_v62, %v1981_v1  ;;  %v2183_v12 = vmax.f32 %v2077_v9, 0.0  ;;  %v2184_v47 = vmax.f32 %v2106_v10, 0.0 }
 0x20e   :  { %v2188_v4 = vmax.f32 %v2051_v6, 0.0 }
 0x20f   :  { %v2187_v3 = vmax.f32 %v2022_v11, 0.0  ;;  %2207 = vst [vmem:[%s3080_s5 + $0x70] sm:$0xff] %v2183_v12 }
 0x210   :  { %2212 = vst [vmem:[%s3080_s5 + $0x98] sm:$0xff] %v2188_v4 }
 0x211   :  { %2211 = vst [vmem:[%s3080_s5 + $0x90] sm:$0xff] %v2187_v3 }
 0x212   :  { %2208 = vst [vmem:[%s3080_s5 + $0x78] sm:$0xff] %v2184_v47 }
 0x213   :  { %v2157_v14 = vpop.f32.mrf.mxu1  ;;  %v2079_v13 = vpop.f32.mrf.mxu2 }
 0x214   :  { %v2128_v15 = vpop.f32.mrf.mxu0  ;;  %v2158_v16 = vadd.f32 %v2157_v14, %v2987_v30  ;;  %v2080_v17 = vadd.f32 %v2079_v13, %v1981_v1  ;;  %v2108_v18 = vpop.f32.mrf.mxu3 }
 0x215   :  { %v2129_v20 = vadd.f32 %v2128_v15, %v2987_v30  ;;  %v2109_v21 = vadd.f32 %v2108_v18, %v1981_v1 }
 0x216   :  { %v2174_v22 = vmax.f32 %v2158_v16, 0.0  ;;  %v2189_v24 = vmax.f32 %v2080_v17, 0.0 }
 0x217   :  { %v2173_v25 = vmax.f32 %v2129_v20, 0.0  ;;  %v2190_v26 = vmax.f32 %v2109_v21, 0.0 }
 0x218   :  { %2198 = vst [vmem:[%s3080_s5 + $0x28] sm:$0xff] %v2174_v22 }
 0x219   :  { %2197 = vst [vmem:[%s3080_s5 + $0x20] sm:$0xff] %v2173_v25 }
 0x21a   :  { %2213 = vst [vmem:[%s3080_s5 + $0xa0] sm:$0xff] %v2189_v24 }
 0x21b   :  { %v2160_v27 = vpop.f32.mrf.mxu1  ;;  %2214 = vst [vmem:[%s3080_s5 + $0xa8] sm:$0xff] %v2190_v26 }
 0x21c   :  { %v2131_v28 = vpop.f32.mrf.mxu0  ;;  %v2161_v23 = vadd.f32 %v2160_v27, %v2997_v40 }
 0x21d   :  { %v2132_v31 = vadd.f32 %v2131_v28, %v2997_v40 }
 0x21e   :  { %v2180_v29 = vmax.f32 %v2161_v23, 0.0 }
 0x21f   :  { %v2179_v32 = vmax.f32 %v2132_v31, 0.0 }
 0x220   :  { %2204 = vst [vmem:[%s3080_s5 + $0x58] sm:$0xff] %v2180_v29 }
 0x221   :  { %2203 = vst [vmem:[%s3080_s5 + $0x50] sm:$0xff] %v2179_v32 }
 0x223   :  { %v2163_v30 = vpop.f32.mrf.mxu1 }
 0x224   :  { %v2134_v34 = vpop.f32.mrf.mxu0  ;;  %v2164_v35 = vadd.f32 %v2163_v30, %v1977_v54 }
 0x225   :  { %v2135_v36 = vadd.f32 %v2134_v34, %v1977_v54 }
 0x226   :  { %v2186_v37 = vmax.f32 %v2164_v35, 0.0 }
 0x227   :  { %v2185_v38 = vmax.f32 %v2135_v36, 0.0 }
 0x228   :  { %2210 = vst [vmem:[%s3080_s5 + $0x88] sm:$0xff] %v2186_v37 }
 0x229   :  { %2209 = vst [vmem:[%s3080_s5 + $0x80] sm:$0xff] %v2185_v38 }
 0x22b   :  { %v2166_v39 = vpop.f32.mrf.mxu1 }
 0x22c   :  { %v2137_v40 = vpop.f32.mrf.mxu0  ;;  %v2167_v41 = vadd.f32 %v2166_v39, %v1981_v1 }
 0x22d   :  { %v2138_v42 = vadd.f32 %v2137_v40, %v1981_v1 }
 0x22e   :  { %v2192_v43 = vmax.f32 %v2167_v41, 0.0 }
 0x22f   :  { %v2191_v44 = vmax.f32 %v2138_v42, 0.0 }
 0x230   :  { %2216 = vst [vmem:[%s3080_s5 + $0xb8] sm:$0xff] %v2192_v43 }
 0x231   :  { %2215 = vst [vmem:[%s3080_s5 + $0xb0] sm:$0xff] %v2191_v44 }

</bundles_post_ra>
